<compile_context>
chip_gen: v7x
topology: tpu7x:2x2x1
jax: 0.10.0
libtpu: 0.0.40
codegen_flags: <defaults>
</compile_context>

<pallas_src>
import jax
import jax.numpy as jnp
from jax.experimental import pallas as pl
from jax.experimental.pallas import tpu as pltpu

LANES = 128
_TARGET_STEP_BYTES = 8 * 1024 * 1024   # combined x+y input bytes per grid step
_VMEM_LIMIT = 32 * 1024 * 1024         # explicit scoped-VMEM budget (all gens)
_PAD_LOGIT = -1e4                      # padded (x=-1e4, y=0) element -> exactly 0 loss


def _round_up(a, b):
    return ((a + b - 1) // b) * b


def _num_tensorcores():
    # v7x exposes two TensorCores per chip; v5e/v6e have one.  Detection is
    # perf-only: a wrong answer only changes how the grid is split.
    try:
        kind = jax.devices()[0].device_kind.lower()
    except Exception:
        return 1
    return 2 if "v7" in kind else 1


def _bce_sum_kernel(x_ref, y_ref, out_ref, acc_ref):
    """Accumulate a vreg-shaped (8,128) partial sum of BCE-with-logits losses."""

    @pl.when(pl.program_id(1) == 0)
    def _():
        acc_ref[...] = jnp.zeros_like(acc_ref)

    x = x_ref[...].astype(jnp.float32)
    y = y_ref[...].astype(jnp.float32)

    # Numerically-stable BCE with logits (PyTorch's formulation):
    #   loss = max(x, 0) - x*y + log1p(exp(-|x|))
    loss = jnp.maximum(x, 0.0) - x * y + jnp.log1p(jnp.exp(-jnp.abs(x)))

    # (tm, 128) -> (tm//8, 8, 128) is layout-identical (row i lives in sublane
    # i%8 of vreg i//8), so the axis-0 sum is a chain of full-vreg VALU adds:
    # no per-step cross-sublane XLU reduce on the accumulation path.
    tm = loss.shape[0]
    acc_ref[...] += jnp.sum(loss.reshape(tm // 8, 8, LANES), axis=0)

    @pl.when(pl.program_id(1) == pl.num_programs(1) - 1)
    def _():
        out_ref[...] = acc_ref[...]


@jax.jit
def bce_with_logits_loss(logits, labels, weight=1.0):
    """mean(BCEWithLogits(logits, labels)) * weight over all elements."""
    assert logits.shape == labels.shape
    n = logits.size

    # ---- static tiling decisions (shapes/dtypes are static under jit) ----
    rows_needed = -(-n // LANES)
    bytes_per_row = LANES * (logits.dtype.itemsize + labels.dtype.itemsize)
    # Dtype-aware block height targeting ~8 MiB of combined input per step,
    # rounded to a multiple of 512 rows (satisfies f32/bf16/int8 sublane tiles).
    tm_cap = max(512, (_TARGET_STEP_BYTES // bytes_per_row) // 512 * 512)
    tm = min(tm_cap, _round_up(rows_needed, 8))
    steps_total = -(-rows_needed // tm)
    num_tc = _num_tensorcores()
    n_parts = num_tc if (num_tc > 1 and steps_total >= num_tc) else 1
    steps = -(-steps_total // n_parts)
    rows = n_parts * steps * tm
    pad = rows * LANES - n

    x = logits.reshape(-1)
    y = labels.reshape(-1)
    if pad:
        # Large-negative logits / zero labels => padded elements contribute
        # exactly 0, so there is no correction term.  allow_input_fusion below
        # lets XLA fuse this pad (and the reshapes) into the pallas_call input
        # reads instead of a separate full HBM pass.
        x = jnp.pad(x, (0, pad), constant_values=_PAD_LOGIT)
        y = jnp.pad(y, (0, pad), constant_values=0)
    x2 = x.reshape(rows, LANES)
    y2 = y.reshape(rows, LANES)

    in_spec = pl.BlockSpec((tm, LANES), lambda c, j: (c * steps + j, 0))

    partials = pl.pallas_call(
        _bce_sum_kernel,
        out_shape=jax.ShapeDtypeStruct((n_parts, 8, LANES), jnp.float32),
        grid_spec=pltpu.PrefetchScalarGridSpec(
            num_scalar_prefetch=0,
            grid=(n_parts, steps),
            in_specs=[in_spec, in_spec],
            out_specs=pl.BlockSpec((None, 8, LANES), lambda c, j: (c, 0, 0)),
            scratch_shapes=[pltpu.VMEM((8, LANES), jnp.float32)],
        ),
        compiler_params=pltpu.CompilerParams(
            dimension_semantics=("parallel", "arbitrary"),
            allow_input_fusion=[True, True],
            vmem_limit_bytes=_VMEM_LIMIT,
        ),
    )(x2, y2)

    total = jnp.sum(partials)
    return (total / jnp.float32(n)) * jnp.asarray(weight, jnp.float32)


def _reference(logits, labels, weight):
    x = logits.astype(jnp.float32)
    y = labels.astype(jnp.float32)
    loss = jnp.maximum(x, 0.0) - x * y + jnp.log1p(jnp.exp(-jnp.abs(x)))
    return jnp.mean(loss) * jnp.float32(weight)


if __name__ == "__main__":
    key = jax.random.PRNGKey(0)
    k1, k2, k3, k4 = jax.random.split(key, 4)

    # NCHW logits/labels (segmentation-style).  Labels are produced in bf16:
    # 0/1 are exactly representable and the narrower stream halves the label
    # HBM traffic (the kernel casts to f32 internally; any dtype works).
    logits = jax.random.normal(k1, (2, 4, 16, 16), dtype=jnp.float32)
    labels = (jax.random.uniform(k2, (2, 4, 16, 16)) > 0.5).astype(jnp.bfloat16)

    # TODO(synk): update_weight(epoch) is host-side Python control flow; here
    # weight is just a runtime scalar argument (no recompile when it changes).
    weight = 1.0
    loss = jax.block_until_ready(bce_with_logits_loss(logits, labels, weight))
    ref = _reference(logits, labels, weight)
    assert jnp.allclose(loss, ref, rtol=1e-5, atol=1e-6), (loss, ref)

    # Unaligned element count + bf16 logits: exercises the large-negative pad
    # path and in-kernel dtype casts, with a scheduled (0.01) weight value.
    logits2 = jax.random.normal(k3, (2, 3, 15, 17), dtype=jnp.bfloat16)
    labels2 = (jax.random.uniform(k4, (2, 3, 15, 17)) > 0.5).astype(jnp.bfloat16)
    weight2 = 0.01
    loss2 = jax.block_until_ready(bce_with_logits_loss(logits2, labels2, weight2))
    ref2 = _reference(logits2, labels2, weight2)
    assert jnp.allclose(loss2, ref2, rtol=1e-5, atol=1e-6), (loss2, ref2)

    print("KERNEL_OK")
</pallas_src>

<mosaic_0001>
module attributes {stable_mosaic.version = 11 : i64} {
  func.func @_bce_sum_kernel(%arg0: i32, %arg1: i32, %arg2: memref<16x128xf32, #tpu.memory_space<vmem>>, %arg3: memref<16x128xbf16, #tpu.memory_space<vmem>>, %arg4: memref<1x8x128xf32, #tpu.memory_space<vmem>>, %arg5: memref<8x128xf32, #tpu.memory_space<vmem>>) attributes {dimension_semantics = [#tpu.dimension_semantics<parallel>, #tpu.dimension_semantics<arbitrary>], iteration_bounds = array<i64: 1, 1>, scalar_prefetch = 0 : i64, scratch_operands = 1 : i64, tpu.core_type = #tpu.core_type<tc>, window_params = [{transform_indices = @transform_0, window_bounds = array<i64: 16, 128>}, {transform_indices = @transform_1, window_bounds = array<i64: 16, 128>}, {transform_indices = @transform_2, window_bounds = array<i64: 1, 8, 128>}]} {
    %c0_i32 = arith.constant 0 : i32
    %0 = arith.cmpi eq, %arg1, %c0_i32 : i32
    %1 = arith.extui %0 : i1 to i32
    %c0_i32_0 = arith.constant 0 : i32
    %2 = arith.cmpi ne, %1, %c0_i32_0 : i32
    scf.if %2 {
      %cst_12 = arith.constant 0.000000e+00 : f32
      %24 = vector.broadcast %cst_12 : f32 to vector<8x128xf32>
      %c0_13 = arith.constant 0 : index
      %c0_14 = arith.constant 0 : index
      %25 = vector.load %arg5[%c0_13, %c0_14] : memref<8x128xf32, #tpu.memory_space<vmem>>, vector<8x128xf32>
      tpu.vector_store %arg5[%c0_13, %c0_14], %24 {strides = array<i32>} : memref<8x128xf32, #tpu.memory_space<vmem>>, vector<8x128xf32>,
    } else {
    }
    %c0 = arith.constant 0 : index
    %c0_1 = arith.constant 0 : index
    %3 = vector.load %arg2[%c0, %c0_1] : memref<16x128xf32, #tpu.memory_space<vmem>>, vector<16x128xf32>
    %c0_2 = arith.constant 0 : index
    %c0_3 = arith.constant 0 : index
    %4 = vector.load %arg3[%c0_2, %c0_3] : memref<16x128xbf16, #tpu.memory_space<vmem>>, vector<16x128xbf16>
    %5 = arith.extf %4 : vector<16x128xbf16> to vector<16x128xf32>
    %cst = arith.constant 0.000000e+00 : f32
    %6 = vector.broadcast %cst : f32 to vector<16x128xf32>
    %7 = arith.maximumf %3, %6 : vector<16x128xf32>
    %8 = arith.mulf %3, %5 : vector<16x128xf32>
    %9 = arith.subf %7, %8 : vector<16x128xf32>
    %10 = math.absf %3 : vector<16x128xf32>
    %cst_4 = arith.constant 0.000000e+00 : f32
    %11 = vector.broadcast %cst_4 : f32 to vector<16x128xf32>
    %12 = arith.subf %11, %10 : vector<16x128xf32>
    %13 = math.exp %12 : vector<16x128xf32>
    %14 = math.log1p %13 : vector<16x128xf32>
    %15 = arith.addf %9, %14 : vector<16x128xf32>
    %c0_5 = arith.constant 0 : index
    %c0_6 = arith.constant 0 : index
    %16 = vector.load %arg5[%c0_5, %c0_6] : memref<8x128xf32, #tpu.memory_space<vmem>>, vector<8x128xf32>
    %17 = vector.shape_cast %15 : vector<16x128xf32> to vector<2x8x128xf32>
    %cst_7 = arith.constant dense<0.000000e+00> : vector<8x128xf32>
    %18 = vector.multi_reduction <add>, %17, %cst_7 [0] : vector<2x8x128xf32> to vector<8x128xf32>
    %19 = arith.addf %16, %18 : vector<8x128xf32>
    %c0_8 = arith.constant 0 : index
    %c0_9 = arith.constant 0 : index
    %20 = vector.load %arg5[%c0_8, %c0_9] : memref<8x128xf32, #tpu.memory_space<vmem>>, vector<8x128xf32>
    tpu.vector_store %arg5[%c0_8, %c0_9], %19 {strides = array<i32>} : memref<8x128xf32, #tpu.memory_space<vmem>>, vector<8x128xf32>,
    %c0_i32_10 = arith.constant 0 : i32
    %21 = arith.cmpi eq, %arg1, %c0_i32_10 : i32
    %22 = arith.extui %21 : i1 to i32
    %c0_i32_11 = arith.constant 0 : i32
    %23 = arith.cmpi ne, %22, %c0_i32_11 : i32
    scf.if %23 {
      %c0_12 = arith.constant 0 : index
      %c0_13 = arith.constant 0 : index
      %24 = vector.load %arg5[%c0_12, %c0_13] : memref<8x128xf32, #tpu.memory_space<vmem>>, vector<8x128xf32>
      %c0_14 = arith.constant 0 : index
      %c0_15 = arith.constant 0 : index
      %c0_16 = arith.constant 0 : index
      %25 = vector.load %arg4[%c0_14, %c0_15, %c0_16] : memref<1x8x128xf32, #tpu.memory_space<vmem>>, vector<1x8x128xf32>
      %26 = vector.shape_cast %25 : vector<1x8x128xf32> to vector<8x128xf32>
      %27 = vector.shape_cast %24 : vector<8x128xf32> to vector<1x8x128xf32>
      tpu.vector_store %arg4[%c0_14, %c0_15, %c0_16], %27 {strides = array<i32>} : memref<1x8x128xf32, #tpu.memory_space<vmem>>, vector<1x8x128xf32>,
    } else {
    }
    return
  }
  func.func @transform_0(%arg0: i32, %arg1: i32) -> (i32, i32) {
    %c1_i32 = arith.constant 1 : i32
    %0 = arith.muli %arg0, %c1_i32 : i32
    %1 = arith.addi %0, %arg1 : i32
    %c0_i32 = arith.constant 0 : i32
    %c0_i32_0 = arith.constant 0 : i32
    return %1, %c0_i32 : i32, i32
  }
  func.func @transform_1(%arg0: i32, %arg1: i32) -> (i32, i32) {
    %c1_i32 = arith.constant 1 : i32
    %0 = arith.muli %arg0, %c1_i32 : i32
    %1 = arith.addi %0, %arg1 : i32
    %c0_i32 = arith.constant 0 : i32
    %c0_i32_0 = arith.constant 0 : i32
    return %1, %c0_i32 : i32, i32
  }
  func.func @transform_2(%arg0: i32, %arg1: i32) -> (i32, i32, i32) {
    %c0_i32 = arith.constant 0 : i32
    %c0_i32_0 = arith.constant 0 : i32
    %c0_i32_1 = arith.constant 0 : i32
    return %arg0, %c0_i32, %c0_i32_0 : i32, i32, i32
  }
}

</mosaic_0001>

<bundles_post_ra>
// kernel: bce_with_logits_loss.1
= control target key start
LH: loop header
LB: loop body
LE: loop exit
PB: predicated region body
PF: predicated region fallthrough
CT: control target
= control target key end

     0   :  { %s164_s0 = inlined_call_operand.vmem [shape: f32[16,128], index: 0, kind: input, shape index: {}]   ;;  %s165_s1 = inlined_call_operand.vmem [shape: bf16[16,128], index: 1, kind: input, shape index: {}]   ;;  %s166_s2 = inlined_call_operand.vmem [shape: f32[1,8,128], index: 2, kind: output, shape index: {}]  }
   0x1   :  { %v60_v0 = vld [vmem:[%s164_s0] sm:$0xff]  ;;  %v61_v1 = vld [vmem:[%s164_s0 + $0x8] sm:$0xff] }
   0x2   :  { %v72_v2 = vand.u32 2147483647, %v60_v0  ;;  %v73_v3 = vand.u32 2147483647, %v61_v1  ;;  %v126_v11 = vld [vmem:[%s165_s1] sm:$0xff]   ;;  %v66_v18 = vmax.f32 %v60_v0, 0.0 }
   0x3   :  { %v127_v14 = vunpack.c.l.bf16 %v126_v11  ;;  %v128_v16 = vunpack.c.h.bf16 %v126_v11  ;;  %v67_v22 = vmax.f32 %v61_v1, 0.0 }
   0x4   :  { %v74_v4 = vsub.f32 0.0, %v72_v2  ;;  %v75_v5 = vsub.f32 0.0, %v73_v3 }
   0x5   :  { %v68_v19 = vmul.f32 %v127_v14, %v60_v0  ;;  %v69_v23 = vmul.f32 %v128_v16, %v61_v1 }
   0x6   :  { %v76_v6 = vmul.f32 1.442695, %v74_v4  ;;  %v78_v7 = vmul.f32 1.442695, %v75_v5 }
   0x7   :  { %v70_v27 = vsub.f32 %v66_v18, %v68_v19  ;;  %v71_v30 = vsub.f32 %v67_v22, %v69_v23 }
   0x8   :  { %129 = vpow2.f32 %v76_v6 }
   0x9   :  { %131 = vpow2.f32 %v78_v7 }
  0x12   :  { %v130_v8 = vpop.eup %129 }
  0x13   :  { %v132_v9 = vpop.eup %131  ;;  %v80_v10 = vadd.f32 1.0, %v130_v8  ;;  %v83_v13 = vmul.f32 -0.5, %v130_v8  ;;  %v86_v20 = vand.u32 2147483647, %v130_v8 }
  0x14   :  { %v89_v12 = vadd.f32 1.0, %v132_v9  ;;  %v92_v15 = vmul.f32 -0.5, %v132_v9  ;;  %v95_v24 = vand.u32 2147483647, %v132_v9 }
  0x15   :  { %133 = vlog2.f32 %v80_v10  ;;  %v84_v17 = vadd.f32 1.0, %v83_v13  ;;  %vm87_vm0 = vcmp.lt.f32.partialorder %v86_v20, 0.0004427343 }
  0x16   :  { %135 = vlog2.f32 %v89_v12  ;;  %v93_v21 = vadd.f32 1.0, %v92_v15  ;;  %vm96_vm1 = vcmp.lt.f32.partialorder %v95_v24, 0.0004427343 }
  0x17   :  { %v85_v25 = vmul.f32 %v130_v8, %v84_v17 }
  0x18   :  { %v94_v28 = vmul.f32 %v132_v9, %v93_v21 }
  0x1f   :  { %v134_v26 = vpop.eup %133 }
  0x20   :  { %v136_v29 = vpop.eup %135  ;;  %v82_v31 = vmul.f32 0.6931472, %v134_v26 }
  0x21   :  { %v91_v32 = vmul.f32 0.6931472, %v136_v29 }
  0x22   :  { %v88_v33 = vsel %vm87_vm0, %v85_v25, %v82_v31 }
  0x23   :  { %v97_v34 = vsel %vm96_vm1, %v94_v28, %v91_v32  ;;  %v98_v35 = vadd.f32 %v88_v33, %v70_v27 }
  0x24   :  { %v99_v36 = vadd.f32 %v97_v34, %v71_v30 }
  0x26   :  { %v101_v37 = vadd.f32 %v99_v36, %v98_v35 }
  0x28   :  { %108 = vst [vmem:[%s166_s2] sm:$0xff] %v101_v37 }

</bundles_post_ra>
